<compile_context>
chip_gen: v7x
topology: tpu7x:2x2x1
jax: 0.10.0
libtpu: 0.0.40
codegen_flags: <defaults>
</compile_context>

<pallas_src>
import functools

import jax
import jax.numpy as jnp
from jax.experimental import pallas as pl
from jax.experimental.pallas import tpu as pltpu

D_IN = 7                  # 2 (vel) + 2 (extend) + 3 (agent type)
HIDDEN = 32               # config.MODEL.HIDDEN_DIM
PACK = 4                  # rows per packed super-row -> output lane width PACK*HIDDEN = 128
SUBLANE_ALIGN = 16        # row alignment that satisfies both f32 (8) and bf16 (16) sublanes
MAX_TILE_PACKED = 4096    # packed rows per grid step (feedback: 2048-4096)
MIN_GRID_STEPS = 2        # keep >=2 steps so v7x megacore can use both TensorCores
SMALL_M_THRESHOLD = 2048  # below this many rows, plain XLA dot beats pallas_call overhead


def _round_up(x, m):
    return ((x + m - 1) // m) * m


def _fused_mlp_kernel(x_ref, w1_ref, b1_ref, w2_ref, b2_ref, o_ref):
    # x_ref:  [TM, P*Dp]   row-packed input tile (compute dtype: f32 or bf16)
    # w1_ref: [P*Dp, P*H]  block-diagonal,  b1_ref: [1, P*H] (f32)
    # w2_ref: [P*H,  P*H]  block-diagonal,  b2_ref: [1, P*H] (f32)
    # o_ref:  [TM, P*H]    lane-dense (multiple-of-128-wide) output tile
    x = x_ref[...]
    h = jnp.dot(x, w1_ref[...], preferred_element_type=jnp.float32) + b1_ref[...]
    h = jnp.maximum(h, 0.0)                 # ReLU on the VPU, f32
    h = h.astype(w2_ref.dtype)              # back to compute dtype for the second MXU pass
    o = jnp.dot(h, w2_ref[...], preferred_element_type=jnp.float32) + b2_ref[...]
    o_ref[...] = o.astype(o_ref.dtype)


def _block_diag(w, p):
    """Place `w` (d_in, d_out) p times along the diagonal -> (p*d_in, p*d_out)."""
    d_in, d_out = w.shape
    out = jnp.zeros((p * d_in, p * d_out), w.dtype)
    for i in range(p):
        out = out.at[i * d_in:(i + 1) * d_in, i * d_out:(i + 1) * d_out].set(w)
    return out


def pack_params(params, *, pack=PACK, compute_dtype=jnp.float32):
    """Build block-diagonal weights ONCE at init time (not per forward call)."""
    w1, b1, w2, b2 = params["w1"], params["b1"], params["w2"], params["b2"]
    d_in, hidden = w1.shape
    d_in_pad = _round_up(d_in, 8)                       # aligned K for the first matmul
    w1_pad = jnp.zeros((d_in_pad, hidden), w1.dtype).at[:d_in].set(w1)
    return {
        "raw": params,
        "w1_blk": _block_diag(w1_pad, pack).astype(compute_dtype),   # (pack*d_in_pad, pack*H)
        "w2_blk": _block_diag(w2, pack).astype(compute_dtype),       # (pack*H, pack*H)
        "b1_blk": jnp.tile(b1, pack).reshape(1, pack * hidden).astype(jnp.float32),
        "b2_blk": jnp.tile(b2, pack).reshape(1, pack * hidden).astype(jnp.float32),
        "pack": pack,
        "hidden": hidden,
    }


@functools.partial(jax.jit, static_argnames=("pack", "out_dtype"))
def _mlp_pallas(x2d, w1_blk, b1_blk, w2_blk, b2_blk, *, pack, out_dtype):
    """Fused 2-layer MLP on flattened rows via the row-packed Pallas kernel."""
    M, d_in = x2d.shape
    dp = w1_blk.shape[0]                     # pack * d_in_pad
    d_in_pad = dp // pack
    hp = w2_blk.shape[1]                     # pack * hidden
    hidden = hp // pack

    # Minimal padding only: rows to a multiple of pack*SUBLANE_ALIGN, cols to d_in_pad.
    row_align = pack * SUBLANE_ALIGN
    m_pad = _round_up(M, row_align)
    x = x2d.astype(w1_blk.dtype)             # bf16 inputs halve the x read stream
    if m_pad != M or d_in_pad != d_in:
        x = jnp.pad(x, ((0, m_pad - M), (0, d_in_pad - d_in)))
    mp = m_pad // pack
    x_packed = x.reshape(mp, dp)             # contiguous row packing

    # Big tiles to amortize the ~0.35us per-step overhead, but keep >= MIN_GRID_STEPS
    # grid steps so the "parallel" axis can be sharded across v7x's two TensorCores.
    tmp = _round_up(max(1, pl.cdiv(mp, MIN_GRID_STEPS)), SUBLANE_ALIGN)
    tmp = max(SUBLANE_ALIGN, min(MAX_TILE_PACKED, tmp))
    grid = (pl.cdiv(mp, tmp),)               # ragged final block: OOB writes are dropped

    in_itm = jnp.dtype(w1_blk.dtype).itemsize
    out_itm = jnp.dtype(out_dtype).itemsize
    cost = pl.CostEstimate(
        flops=2 * mp * (dp * hp + hp * hp),  # actual block-diagonal kernel work
        transcendentals=0,
        bytes_accessed=(mp * dp * in_itm + mp * hp * out_itm
                        + (w1_blk.size + w2_blk.size) * in_itm
                        + (b1_blk.size + b2_blk.size) * 4),
    )

    out_packed = pl.pallas_call(
        _fused_mlp_kernel,
        out_shape=jax.ShapeDtypeStruct((mp, hp), out_dtype),
        grid_spec=pl.GridSpec(
            grid=grid,
            in_specs=[
                pl.BlockSpec((tmp, dp), lambda i: (i, 0)),   # x tile walks the rows
                pl.BlockSpec((dp, hp), lambda i: (0, 0)),    # weights stay VMEM-resident
                pl.BlockSpec((1, hp), lambda i: (0, 0)),
                pl.BlockSpec((hp, hp), lambda i: (0, 0)),
                pl.BlockSpec((1, hp), lambda i: (0, 0)),
            ],
            out_specs=pl.BlockSpec((tmp, hp), lambda i: (i, 0)),
        ),
        compiler_params=pltpu.CompilerParams(
            dimension_semantics=("parallel",),   # pure row-parallel axis (v7x megacore)
        ),
        cost_estimate=cost,
    )(x_packed, w1_blk, b1_blk, w2_blk, b2_blk)

    out = out_packed.reshape(m_pad, hidden)
    if m_pad != M:
        out = out[:M]
    return out


@functools.partial(jax.jit, static_argnames=("out_dtype",))
def _mlp_xla(prompt, params, *, out_dtype):
    # Small-M fast path: pallas_call fixed overhead dominates below a few k rows.
    h = jnp.maximum(prompt @ params["w1"] + params["b1"], 0.0)
    return (h @ params["w2"] + params["b2"]).astype(out_dtype)


def prompt_state_encoder(prompt, packed, *, out_dtype=jnp.float32, force_pallas=False):
    """state_encoder = Linear(D_in->H) -> ReLU -> Linear(H->H) (ret_before_act=True).

    prompt: [B, N, D_in] float32. Returns [B, N, H] in `out_dtype`
    (default f32 to match the PyTorch module; pass bf16 if downstream tolerates it).
    """
    B, N, d_in = prompt.shape
    M = B * N
    hidden = packed["hidden"]

    if (not force_pallas) and M < SMALL_M_THRESHOLD:
        return _mlp_xla(prompt, packed["raw"], out_dtype=out_dtype)

    out = _mlp_pallas(
        prompt.reshape(M, d_in),
        packed["w1_blk"], packed["b1_blk"], packed["w2_blk"], packed["b2_blk"],
        pack=packed["pack"], out_dtype=out_dtype)
    return out.reshape(B, N, hidden)


def prompt_encoder_forward(prompt_input, packed_params, *, out_dtype=jnp.float32,
                           force_pallas=False):
    """Mirrors PromptEncoder.forward: returns (prompt_emd, prompt_mask)."""
    prompt = prompt_input["prompt"]
    prompt_mask = prompt_input["prompt_mask"]
    prompt_emd = prompt_state_encoder(prompt, packed_params, out_dtype=out_dtype,
                                      force_pallas=force_pallas)
    return prompt_emd, prompt_mask


def init_params(key, d_in, hidden):
    # Matches _init_weights: Linear weights ~ N(0, 0.02), biases zero.
    k1, k2 = jax.random.split(key)
    w1 = (0.02 * jax.random.normal(k1, (d_in, hidden))).astype(jnp.float32)
    w2 = (0.02 * jax.random.normal(k2, (hidden, hidden))).astype(jnp.float32)
    return {"w1": w1, "b1": jnp.zeros((hidden,), jnp.float32),
            "w2": w2, "b2": jnp.zeros((hidden,), jnp.float32)}


def _reference(prompt, params):
    h = jnp.maximum(prompt @ params["w1"] + params["b1"], 0.0)
    return h @ params["w2"] + params["b2"]


if __name__ == "__main__":
    key = jax.random.PRNGKey(0)
    kx, km, kp, kx2 = jax.random.split(key, 4)

    params = init_params(kp, D_IN, HIDDEN)
    packed_f32 = pack_params(params, compute_dtype=jnp.float32)

    # --- small case (B=2, N=8): module-shaped inputs, force the Pallas path ---
    B, N = 2, 8
    prompt = jax.random.normal(kx, (B, N, D_IN), dtype=jnp.float32)
    prompt_mask = jax.random.bernoulli(km, p=0.8, shape=(B, N))
    prompt_input = {"prompt": prompt, "prompt_mask": prompt_mask}

    emd, out_mask = prompt_encoder_forward(prompt_input, packed_f32, force_pallas=True)
    emd = jax.block_until_ready(emd)
    out_mask = jax.block_until_ready(out_mask)

    ref = _reference(prompt, params)
    assert emd.shape == (B, N, HIDDEN)
    assert out_mask.shape == (B, N)
    assert bool(jnp.all(out_mask == prompt_mask))
    assert jnp.allclose(emd, ref, atol=1e-5, rtol=1e-5)

    # --- medium case: dispatcher picks the Pallas path, multi-step grid + ragged block
    B2, N2 = 4, 520                      # M = 2080 rows -> 528 packed rows, grid of 2
    prompt2 = jax.random.normal(kx2, (B2, N2, D_IN), dtype=jnp.float32)
    emd2 = jax.block_until_ready(prompt_state_encoder(prompt2, packed_f32))
    assert jnp.allclose(emd2, _reference(prompt2, params), atol=5e-5, rtol=1e-4)

    # --- bf16 matmul inputs + bf16 output stream (v7x recommendation) ---
    packed_bf16 = pack_params(params, compute_dtype=jnp.bfloat16)
    emd_bf16 = prompt_state_encoder(prompt2, packed_bf16, out_dtype=jnp.bfloat16,
                                    force_pallas=True)
    emd_bf16 = jax.block_until_ready(emd_bf16)
    assert jnp.allclose(emd_bf16.astype(jnp.float32), _reference(prompt2, params),
                        atol=1e-2, rtol=1e-1)

    print("KERNEL_OK")
</pallas_src>

<mosaic_0001>
module attributes {stable_mosaic.version = 11 : i64} {
  func.func @_fused_mlp_kernel(%arg0: i32, %arg1: memref<16x32xf32, #tpu.memory_space<vmem>>, %arg2: memref<32x128xf32, #tpu.memory_space<vmem>>, %arg3: memref<1x128xf32, #tpu.memory_space<vmem>>, %arg4: memref<128x128xf32, #tpu.memory_space<vmem>>, %arg5: memref<1x128xf32, #tpu.memory_space<vmem>>, %arg6: memref<16x128xf32, #tpu.memory_space<vmem>>) attributes {dimension_semantics = [#tpu.dimension_semantics<parallel>], iteration_bounds = array<i64: 1>, scalar_prefetch = 0 : i64, scratch_operands = 0 : i64, tpu.core_type = #tpu.core_type<tc>, window_params = [{transform_indices = @transform_0, window_bounds = array<i64: 16, 32>}, {pipeline_mode = #tpu.pipeline_mode<synchronous>, transform_indices = @transform_1, window_bounds = array<i64: 32, 128>}, {pipeline_mode = #tpu.pipeline_mode<synchronous>, transform_indices = @transform_2, window_bounds = array<i64: 1, 128>}, {pipeline_mode = #tpu.pipeline_mode<synchronous>, transform_indices = @transform_3, window_bounds = array<i64: 128, 128>}, {pipeline_mode = #tpu.pipeline_mode<synchronous>, transform_indices = @transform_4, window_bounds = array<i64: 1, 128>}, {transform_indices = @transform_5, window_bounds = array<i64: 16, 128>}]} {
    %c0 = arith.constant 0 : index
    %c0_0 = arith.constant 0 : index
    %0 = vector.load %arg1[%c0, %c0_0] : memref<16x32xf32, #tpu.memory_space<vmem>>, vector<16x32xf32>
    %c0_1 = arith.constant 0 : index
    %c0_2 = arith.constant 0 : index
    %1 = vector.load %arg2[%c0_1, %c0_2] : memref<32x128xf32, #tpu.memory_space<vmem>>, vector<32x128xf32>
    %cst = arith.constant dense<0.000000e+00> : vector<16x128xf32>
    %2 = tpu.matmul %0, %1, %cst {dimension_numbers = #tpu.dot_dimension_numbers<[1], [0], [0], [1], [0, 0, 1, 1], [], []>} : vector<16x32xf32>, vector<32x128xf32>, vector<16x128xf32> -> vector<16x128xf32>
    %c0_3 = arith.constant 0 : index
    %c0_4 = arith.constant 0 : index
    %3 = vector.load %arg3[%c0_3, %c0_4] : memref<1x128xf32, #tpu.memory_space<vmem>>, vector<1x128xf32>
    %4 = vector.broadcast %3 : vector<1x128xf32> to vector<16x128xf32>
    %5 = arith.addf %2, %4 : vector<16x128xf32>
    %cst_5 = arith.constant 0.000000e+00 : f32
    %6 = vector.broadcast %cst_5 : f32 to vector<16x128xf32>
    %7 = arith.maximumf %5, %6 : vector<16x128xf32>
    %c0_6 = arith.constant 0 : index
    %c0_7 = arith.constant 0 : index
    %8 = vector.load %arg4[%c0_6, %c0_7] : memref<128x128xf32, #tpu.memory_space<vmem>>, vector<128x128xf32>
    %cst_8 = arith.constant dense<0.000000e+00> : vector<16x128xf32>
    %9 = tpu.matmul %7, %8, %cst_8 {dimension_numbers = #tpu.dot_dimension_numbers<[1], [0], [0], [1], [0, 0, 1, 1], [], []>} : vector<16x128xf32>, vector<128x128xf32>, vector<16x128xf32> -> vector<16x128xf32>
    %c0_9 = arith.constant 0 : index
    %c0_10 = arith.constant 0 : index
    %10 = vector.load %arg5[%c0_9, %c0_10] : memref<1x128xf32, #tpu.memory_space<vmem>>, vector<1x128xf32>
    %11 = vector.broadcast %10 : vector<1x128xf32> to vector<16x128xf32>
    %12 = arith.addf %9, %11 : vector<16x128xf32>
    %c0_11 = arith.constant 0 : index
    %c0_12 = arith.constant 0 : index
    %13 = vector.load %arg6[%c0_11, %c0_12] : memref<16x128xf32, #tpu.memory_space<vmem>>, vector<16x128xf32>
    tpu.vector_store %arg6[%c0_11, %c0_12], %12 {strides = array<i32>} : memref<16x128xf32, #tpu.memory_space<vmem>>, vector<16x128xf32>,
    return
  }
  func.func @transform_0(%arg0: i32) -> (i32, i32) {
    %c0_i32 = arith.constant 0 : i32
    %c0_i32_0 = arith.constant 0 : i32
    return %arg0, %c0_i32 : i32, i32
  }
  func.func @transform_1(%arg0: i32) -> (i32, i32) {
    %c0_i32 = arith.constant 0 : i32
    %c0_i32_0 = arith.constant 0 : i32
    %c0_i32_1 = arith.constant 0 : i32
    return %c0_i32, %c0_i32_0 : i32, i32
  }
  func.func @transform_2(%arg0: i32) -> (i32, i32) {
    %c0_i32 = arith.constant 0 : i32
    %c0_i32_0 = arith.constant 0 : i32
    %c0_i32_1 = arith.constant 0 : i32
    return %c0_i32, %c0_i32_0 : i32, i32
  }
  func.func @transform_3(%arg0: i32) -> (i32, i32) {
    %c0_i32 = arith.constant 0 : i32
    %c0_i32_0 = arith.constant 0 : i32
    %c0_i32_1 = arith.constant 0 : i32
    return %c0_i32, %c0_i32_0 : i32, i32
  }
  func.func @transform_4(%arg0: i32) -> (i32, i32) {
    %c0_i32 = arith.constant 0 : i32
    %c0_i32_0 = arith.constant 0 : i32
    %c0_i32_1 = arith.constant 0 : i32
    return %c0_i32, %c0_i32_0 : i32, i32
  }
  func.func @transform_5(%arg0: i32) -> (i32, i32) {
    %c0_i32 = arith.constant 0 : i32
    %c0_i32_0 = arith.constant 0 : i32
    return %arg0, %c0_i32 : i32, i32
  }
}

</mosaic_0001>

<bundles_post_ra>
// kernel: _mlp_pallas.1
= control target key start
LH: loop header
LB: loop body
LE: loop exit
PB: predicated region body
PF: predicated region fallthrough
CT: control target
= control target key end

     0   :  { %vm33_vm0 = vcmask 261120   ;;  %s445_s1 = inlined_call_operand.vmem [shape: f32[32,128], index: 1, kind: input, shape index: {}]   ;;  %s446_s0 = inlined_call_operand.vmem [shape: f32[16,32], index: 0, kind: input, shape index: {}]   ;;  %s447_s3 = inlined_call_operand.vmem [shape: f32[128,128], index: 3, kind: input, shape index: {}]   ;;  %s448_s2 = inlined_call_operand.vmem [shape: f32[1,128], index: 2, kind: input, shape index: {}]   ;;  %s449_s4 = inlined_call_operand.vmem [shape: f32[1,128], index: 4, kind: input, shape index: {}]   ;;  %s450_s5 = inlined_call_operand.vmem [shape: f32[16,128], index: 5, kind: output, shape index: {}]  }
   0x1   :  { %v22_v0 = vld [vmem:[%s445_s1] sm:$0xff]  ;;  %v23_v1 = vld [vmem:[%s445_s1 + $0x8] sm:$0xff]  ;;  %v24_v2 = vld [vmem:[%s445_s1 + $0x10] sm:$0xff] }
   0x2   :  { %v295_v3 = vpack.c.bf16 %v23_v1, %v22_v0  ;;  %v25_v4 = vld [vmem:[%s445_s1 + $0x18] sm:$0xff]  ;;  %v20_v5 = vld [vmem:[%s446_s0] sm:$0xff]  ;;  %v118_v8 = vld [vmem:[%s447_s3 + $0x8] sm:$0xff] }
   0x3   :  { %v299_v6 = vpack.c.bf16 %v25_v4, %v24_v2  ;;  %257 = vmatprep.mubr.msk.f32.mxu0 %vm33_vm0, %v20_v5  ;;  %v117_v7 = vld [vmem:[%s447_s3] sm:$0xff]  ;;  %v119_v9 = vld [vmem:[%s447_s3 + $0x10] sm:$0xff]  ;;  %v120_v11 = vld [vmem:[%s447_s3 + $0x18] sm:$0xff] }
   0x4   :  { %296 = vmatprep.subr.bf16.mxu0 %v295_v3  ;;  %v303_v10 = vpack.c.bf16 %v118_v8, %v117_v7  ;;  %v307_v12 = vpack.c.bf16 %v120_v11, %v119_v9  ;;  %v121_v13 = vld [vmem:[%s447_s3 + $0x20] sm:$0xff]  ;;  %v122_v14 = vld [vmem:[%s447_s3 + $0x28] sm:$0xff]  ;;  %v123_v17 = vld [vmem:[%s447_s3 + $0x30] sm:$0xff] }
   0x5   :  { %298 = vmatpush3.bf16.msra.mxu0 %v295_v3  ;;  %v311_v15 = vpack.c.bf16 %v122_v14, %v121_v13  ;;  %v21_v16 = vld [vmem:[%s446_s0 + $0x8] sm:$0xff]  ;;  %v124_v18 = vld [vmem:[%s447_s3 + $0x38] sm:$0xff]  ;;  %v125_v20 = vld [vmem:[%s447_s3 + $0x40] sm:$0xff] }
   0x6   :  { %300 = vmatprep.subr.bf16.mxu0 %v299_v6  ;;  %304 = vmatprep.subr.bf16.mxu1 %v303_v10  ;;  %v315_v19 = vpack.c.bf16 %v124_v18, %v123_v17  ;;  %v126_v21 = vld [vmem:[%s447_s3 + $0x48] sm:$0xff]  ;;  %v127_v23 = vld [vmem:[%s447_s3 + $0x50] sm:$0xff]  ;;  %v128_v24 = vld [vmem:[%s447_s3 + $0x58] sm:$0xff] }
   0x7   :  { %306 = vmatpush3.bf16.msra.mxu1 %v303_v10  ;;  %v319_v22 = vpack.c.bf16 %v126_v21, %v125_v20  ;;  %v323_v25 = vpack.c.bf16 %v128_v24, %v127_v23  ;;  %v129_v26 = vld [vmem:[%s447_s3 + $0x60] sm:$0xff]  ;;  %v130_v27 = vld [vmem:[%s447_s3 + $0x68] sm:$0xff]  ;;  %v131_v29 = vld [vmem:[%s447_s3 + $0x70] sm:$0xff] }
   0x8   :  { %308 = vmatprep.subr.bf16.mxu1 %v307_v12  ;;  %v327_v28 = vpack.c.bf16 %v130_v27, %v129_v26  ;;  %v132_v30 = vld [vmem:[%s447_s3 + $0x78] sm:$0xff]  ;;  %v221_v32 = vld [vmem:[%s448_s2] ss:$0 sm:$0xff] }
   0x9   :  { %302 = vmatpush3.bf16.msra.mxu0 %v299_v6  ;;  %v331_v31 = vpack.c.bf16 %v132_v30, %v131_v29  ;;  %v224_v39 = vld [vmem:[%s449_s4] ss:$0 sm:$0xff] }
   0xb   :  { %310 = vmatpush3.bf16.msra.mxu1 %v307_v12 }
   0xc   :  { %258 = vmatmul.mubr.msk.f32.vlgmr.msra.gmra.mrb[0].mxu0 %vm33_vm0, %v21_v16  ;;  %312 = vmatprep.subr.bf16.mxu1 %v311_v15 }
   0xf   :  { %314 = vmatpush3.bf16.msra.mxu1 %v311_v15 }
  0x10   :  { %316 = vmatprep.subr.bf16.mxu1 %v315_v19 }
  0x13   :  { %318 = vmatpush3.bf16.msra.mxu1 %v315_v19 }
  0x14   :  { %320 = vmatprep.subr.bf16.mxu1 %v319_v22 }
  0x17   :  { %322 = vmatpush3.bf16.msra.mxu1 %v319_v22 }
  0x18   :  { %324 = vmatprep.subr.bf16.mxu1 %v323_v25 }
  0x1b   :  { %326 = vmatpush3.bf16.msra.mxu1 %v323_v25 }
  0x1c   :  { %328 = vmatprep.subr.bf16.mxu1 %v327_v28 }
  0x1f   :  { %330 = vmatpush3.bf16.msra.mxu1 %v327_v28 }
  0x20   :  { %332 = vmatprep.subr.bf16.mxu1 %v331_v31 }
  0x23   :  { %334 = vmatpush3.bf16.msra.mxu1 %v331_v31 }
  0xdf   :  { %v259_v33 = vpop.f32.mrb[0].mxu0 }
  0xe0   :  { %v112_v34 = vadd.f32 %v259_v33, %v221_v32  ;;  %v106_v35 = vpop.f32.mrb[1].mxu0 }
  0xe1   :  { %v107_v36 = vadd.f32 %v221_v32, %v106_v35 }
  0xe2   :  { %v116_v38 = vmax.f32 %v112_v34, 0.0 }
  0xe3   :  { %v115_v37 = vmax.f32 %v107_v36, 0.0 }
  0xe5   :  { %292 = vmatprep.mubr.f32.mxu1 %v115_v37 }
  0xe6   :  { %293 = vmatmul.mubr.f32.vlgmr.msra.gmra.mrb[0].mxu1 %v116_v38 }
 0x1b9   :  { %v294_v40 = vpop.f32.mrb[0].mxu1 }
 0x1ba   :  { %v212_v41 = vadd.f32 %v294_v40, %v224_v39  ;;  %v206_v42 = vpop.f32.mrb[1].mxu1 }
 0x1bb   :  { %v207_v43 = vadd.f32 %v224_v39, %v206_v42 }
 0x1bc   :  { %216 = vst [vmem:[%s450_s5 + $0x8] sm:$0xff] %v212_v41 }
 0x1bd   :  { %215 = vst [vmem:[%s450_s5] sm:$0xff] %v207_v43 }

</bundles_post_ra>
